<compile_context>
chip_gen: v6e
topology: v6e:2x2x1
jax: 0.10.0
libtpu: 0.0.40
codegen_flags: <defaults>
</compile_context>

<pallas_src>
import functools

import jax
import jax.numpy as jnp
from jax.experimental import pallas as pl
from jax.experimental.pallas import tpu as pltpu

LN_EPS = 1e-5     # torch.nn.LayerNorm default
OUT_PAD = 128     # lane-dense output slab width (minimum vreg lane width)


def _round_up(x, m):
    return (x + m - 1) // m * m


def _layernorm_fused(h, gamma, beta):
    """Single-pass LayerNorm in f32: var = E[h^2] - mu^2 (guarded >= 0)."""
    inv_d = 1.0 / h.shape[-1]
    s1 = jnp.sum(h, axis=-1, keepdims=True)
    s2 = jnp.sum(h * h, axis=-1, keepdims=True)
    mu = s1 * inv_d
    var = jnp.maximum(s2 * inv_d - mu * mu, 0.0)   # guard tiny negative rounding
    return (h - mu) * jax.lax.rsqrt(var + LN_EPS) * gamma + beta


def actor_kernel(x_ref, w1_ref, wh_ref, vec_ref, wo_ref, bo_ref, out_ref):
    # x tile in f32; dot operands are cast to bf16 just before each MXU call.
    x = x_ref[...]

    # Packed per-feature vectors (f32), read once at the top:
    # rows = [b1, g1, be1, b2, g2, be2, b3, g3, be3].
    b1, g1, be1 = vec_ref[0:1, :], vec_ref[1:2, :], vec_ref[2:3, :]
    b2, g2, be2 = vec_ref[3:4, :], vec_ref[4:5, :], vec_ref[5:6, :]
    b3, g3, be3 = vec_ref[6:7, :], vec_ref[7:8, :], vec_ref[8:9, :]

    # fc1 -> relu -> LayerNorm(bn1)
    h = jnp.dot(x.astype(jnp.bfloat16), w1_ref[...],
                preferred_element_type=jnp.float32) + b1
    h = _layernorm_fused(jnp.maximum(h, 0.0), g1, be1)

    # fc2 -> relu -> LayerNorm(bn2)
    h = jnp.dot(h.astype(jnp.bfloat16), wh_ref[0],
                preferred_element_type=jnp.float32) + b2
    h = _layernorm_fused(jnp.maximum(h, 0.0), g2, be2)

    # fc3 -> relu -> LayerNorm(bn3)
    h = jnp.dot(h.astype(jnp.bfloat16), wh_ref[1],
                preferred_element_type=jnp.float32) + b3
    h = _layernorm_fused(jnp.maximum(h, 0.0), g3, be3)

    # output head (lane-padded to 128) -> tanh, stored as one unmasked slab.
    o = jnp.dot(h.astype(jnp.bfloat16), wo_ref[...],
                preferred_element_type=jnp.float32) + bo_ref[...]
    out_ref[...] = jnp.tanh(o)


def _choose_batch_tile(batch):
    """Pick (tile_b, padded_batch) for the 1-D batch grid.

    * multiple of 8 sublanes
    * >= 2 grid steps when batch >= 16, so dimension_semantics=("parallel",)
      can shard the batch across both v7x TensorCores
    * cap 1024 rows/step (weights are resident; per-step VMEM stays tiny)
    """
    padded = _round_up(batch, 8)
    if batch >= 16:
        tile = _round_up(pl.cdiv(padded, 2), 8)
    else:
        tile = padded
    tile = min(tile, 1024)
    padded = _round_up(batch, tile)
    return tile, padded


@functools.partial(jax.jit, static_argnames=("n_actions",))
def actor_forward(x, packed, *, n_actions):
    batch, in_dim = x.shape
    hid = packed["w1"].shape[1]

    tile_b, padded_b = _choose_batch_tile(batch)
    if padded_b != batch:
        x = jnp.pad(x, ((0, padded_b - batch), (0, 0)))

    grid = (padded_b // tile_b,)

    cost = pl.CostEstimate(
        flops=2 * padded_b * (in_dim * hid + 2 * hid * hid + hid * OUT_PAD),
        transcendentals=padded_b * (OUT_PAD + 3),          # tanh + 3x rsqrt per row
        bytes_accessed=(4 * padded_b * in_dim                               # x (f32)
                        + 2 * (packed["w1"].size + packed["w_hidden"].size
                               + packed["wo"].size)                         # bf16 weights
                        + 4 * (packed["vecs"].size + packed["bo"].size)     # f32 vectors
                        + 4 * padded_b * OUT_PAD),                          # out (f32)
    )

    out = pl.pallas_call(
        actor_kernel,
        out_shape=jax.ShapeDtypeStruct((padded_b, OUT_PAD), jnp.float32),
        grid=grid,
        in_specs=[
            pl.BlockSpec((tile_b, in_dim), lambda i: (i, 0)),       # x: streams
            pl.BlockSpec((in_dim, hid), lambda i: (0, 0)),          # w1 (bf16): resident
            pl.BlockSpec((2, hid, hid), lambda i: (0, 0, 0)),       # w2,w3 packed (bf16)
            pl.BlockSpec((9, hid), lambda i: (0, 0)),               # bias/gamma/beta (f32)
            pl.BlockSpec((hid, OUT_PAD), lambda i: (0, 0)),         # wo (bf16, lane-padded)
            pl.BlockSpec((1, OUT_PAD), lambda i: (0, 0)),           # bo (f32, lane-padded)
        ],
        out_specs=pl.BlockSpec((tile_b, OUT_PAD), lambda i: (i, 0)),
        compiler_params=pltpu.CompilerParams(
            dimension_semantics=("parallel",)),
        cost_estimate=cost,
    )(x, packed["w1"], packed["w_hidden"], packed["vecs"],
      packed["wo"], packed["bo"])

    return out[:batch, :n_actions]


def init_actor_params(key, input_dims, fc1=256, fc2=256, fc3=256, n_actions=2,
                      init_w=0.003):
    """Deterministic synthetic init mirroring ActorNetwork.__init__.

    fc1/fc2 weights: fanin_init (uniform +-1/sqrt(size[0]) with size[0]=out_dim,
    as written in the reference). fc3 weight: uniform +-init_w. Output layer and
    all biases: PyTorch Linear default uniform +-1/sqrt(fan_in). LayerNorm:
    gamma=1, beta=0. Weights stored pre-transposed as [in, out], in f32.
    """
    assert fc1 == fc2 == fc3, "packed layout assumes equal hidden widths"
    ks = jax.random.split(key, 10)

    def uni(k, shape, bound):
        return jax.random.uniform(k, shape, jnp.float32, -bound, bound)

    p = {}
    p["w1"] = uni(ks[0], (input_dims, fc1), 1.0 / jnp.sqrt(fc1))
    p["b1"] = uni(ks[1], (1, fc1), 1.0 / jnp.sqrt(input_dims))
    p["w2"] = uni(ks[2], (fc1, fc2), 1.0 / jnp.sqrt(fc2))
    p["b2"] = uni(ks[3], (1, fc2), 1.0 / jnp.sqrt(fc1))
    p["w3"] = uni(ks[4], (fc2, fc3), init_w)
    p["b3"] = uni(ks[5], (1, fc3), 1.0 / jnp.sqrt(fc2))
    p["wo"] = uni(ks[6], (fc3, n_actions), 1.0 / jnp.sqrt(fc3))
    p["bo"] = uni(ks[7], (1, n_actions), 1.0 / jnp.sqrt(fc3))
    for i, d in ((1, fc1), (2, fc2), (3, fc3)):
        p[f"g{i}"] = jnp.ones((1, d), jnp.float32)
        p[f"be{i}"] = jnp.zeros((1, d), jnp.float32)
    return p


def pack_actor_params(p, out_pad=OUT_PAD):
    """One-time host-side packing: bf16 MXU weights, fewer kernel inputs,
    lane-dense output head.  Bias/gamma/beta stay f32 (elementwise path)."""
    hid = p["w1"].shape[1]
    n_actions = p["wo"].shape[1]
    w1 = p["w1"].astype(jnp.bfloat16)                                  # (in, hid)
    w_hidden = jnp.stack([p["w2"], p["w3"]], axis=0).astype(jnp.bfloat16)  # (2, hid, hid)
    vecs = jnp.concatenate(
        [p["b1"], p["g1"], p["be1"],
         p["b2"], p["g2"], p["be2"],
         p["b3"], p["g3"], p["be3"]], axis=0)                          # (9, hid) f32
    wo = (jnp.zeros((hid, out_pad), jnp.float32)
          .at[:, :n_actions].set(p["wo"]).astype(jnp.bfloat16))        # (hid, 128)
    bo = jnp.zeros((1, out_pad), jnp.float32).at[:, :n_actions].set(p["bo"])
    return {"w1": w1, "w_hidden": w_hidden, "vecs": vecs, "wo": wo, "bo": bo}


def actor_forward_ref(x, p):
    """Pure-JAX f32 reference (two-pass LayerNorm, like torch)."""
    def ln(h, g, b):
        mu = h.mean(-1, keepdims=True)
        var = ((h - mu) ** 2).mean(-1, keepdims=True)
        return (h - mu) / jnp.sqrt(var + LN_EPS) * g + b

    h = ln(jnp.maximum(x @ p["w1"] + p["b1"], 0.0), p["g1"], p["be1"])
    h = ln(jnp.maximum(h @ p["w2"] + p["b2"], 0.0), p["g2"], p["be2"])
    h = ln(jnp.maximum(h @ p["w3"] + p["b3"], 0.0), p["g3"], p["be3"])
    return jnp.tanh(h @ p["wo"] + p["bo"])


if __name__ == "__main__":
    key = jax.random.PRNGKey(0)
    k_param, k_x = jax.random.split(key)

    batch = 8
    input_dims = 32
    n_actions = 2

    params = init_actor_params(k_param, input_dims, n_actions=n_actions)
    packed = pack_actor_params(params)
    x = jax.random.normal(k_x, (batch, input_dims), jnp.float32)

    out = actor_forward(x, packed, n_actions=n_actions)
    out = jax.block_until_ready(out)

    ref = actor_forward_ref(x, params)
    assert out.shape == (batch, n_actions)
    # bf16 MXU operands + fused-variance LN vs f32 two-pass reference:
    # tolerance loosened per review (kernel accumulates in f32, elementwise f32).
    assert jnp.allclose(out, ref, atol=5e-2, rtol=5e-2), "mismatch vs reference"

    print("KERNEL_OK")
</pallas_src>

<mosaic_0001>
module attributes {stable_mosaic.version = 11 : i64} {
  func.func @actor_kernel(%arg0: i32, %arg1: memref<8x32xf32, #tpu.memory_space<vmem>>, %arg2: memref<32x256xbf16, #tpu.memory_space<vmem>>, %arg3: memref<2x256x256xbf16, #tpu.memory_space<vmem>>, %arg4: memref<9x256xf32, #tpu.memory_space<vmem>>, %arg5: memref<256x128xbf16, #tpu.memory_space<vmem>>, %arg6: memref<1x128xf32, #tpu.memory_space<vmem>>, %arg7: memref<8x128xf32, #tpu.memory_space<vmem>>) attributes {dimension_semantics = [#tpu.dimension_semantics<parallel>], iteration_bounds = array<i64: 1>, scalar_prefetch = 0 : i64, scratch_operands = 0 : i64, tpu.core_type = #tpu.core_type<tc>, window_params = [{transform_indices = @transform_0, window_bounds = array<i64: 8, 32>}, {pipeline_mode = #tpu.pipeline_mode<synchronous>, transform_indices = @transform_1, window_bounds = array<i64: 32, 256>}, {pipeline_mode = #tpu.pipeline_mode<synchronous>, transform_indices = @transform_2, window_bounds = array<i64: 2, 256, 256>}, {pipeline_mode = #tpu.pipeline_mode<synchronous>, transform_indices = @transform_3, window_bounds = array<i64: 9, 256>}, {pipeline_mode = #tpu.pipeline_mode<synchronous>, transform_indices = @transform_4, window_bounds = array<i64: 256, 128>}, {pipeline_mode = #tpu.pipeline_mode<synchronous>, transform_indices = @transform_5, window_bounds = array<i64: 1, 128>}, {transform_indices = @transform_6, window_bounds = array<i64: 8, 128>}]} {
    %c0 = arith.constant 0 : index
    %c0_0 = arith.constant 0 : index
    %0 = vector.load %arg1[%c0, %c0_0] : memref<8x32xf32, #tpu.memory_space<vmem>>, vector<8x32xf32>
    %c0_1 = arith.constant 0 : index
    %c0_2 = arith.constant 0 : index
    %1 = vector.load %arg4[%c0_1, %c0_2] : memref<9x256xf32, #tpu.memory_space<vmem>>, vector<1x256xf32>
    %c1 = arith.constant 1 : index
    %c0_3 = arith.constant 0 : index
    %2 = vector.load %arg4[%c1, %c0_3] : memref<9x256xf32, #tpu.memory_space<vmem>>, vector<1x256xf32>
    %c2 = arith.constant 2 : index
    %c0_4 = arith.constant 0 : index
    %3 = vector.load %arg4[%c2, %c0_4] : memref<9x256xf32, #tpu.memory_space<vmem>>, vector<1x256xf32>
    %c3 = arith.constant 3 : index
    %c0_5 = arith.constant 0 : index
    %4 = vector.load %arg4[%c3, %c0_5] : memref<9x256xf32, #tpu.memory_space<vmem>>, vector<1x256xf32>
    %c4 = arith.constant 4 : index
    %c0_6 = arith.constant 0 : index
    %5 = vector.load %arg4[%c4, %c0_6] : memref<9x256xf32, #tpu.memory_space<vmem>>, vector<1x256xf32>
    %c5 = arith.constant 5 : index
    %c0_7 = arith.constant 0 : index
    %6 = vector.load %arg4[%c5, %c0_7] : memref<9x256xf32, #tpu.memory_space<vmem>>, vector<1x256xf32>
    %c6 = arith.constant 6 : index
    %c0_8 = arith.constant 0 : index
    %7 = vector.load %arg4[%c6, %c0_8] : memref<9x256xf32, #tpu.memory_space<vmem>>, vector<1x256xf32>
    %c7 = arith.constant 7 : index
    %c0_9 = arith.constant 0 : index
    %8 = vector.load %arg4[%c7, %c0_9] : memref<9x256xf32, #tpu.memory_space<vmem>>, vector<1x256xf32>
    %c8 = arith.constant 8 : index
    %c0_10 = arith.constant 0 : index
    %9 = vector.load %arg4[%c8, %c0_10] : memref<9x256xf32, #tpu.memory_space<vmem>>, vector<1x256xf32>
    %10 = arith.truncf %0 : vector<8x32xf32> to vector<8x32xbf16>
    %c0_11 = arith.constant 0 : index
    %c0_12 = arith.constant 0 : index
    %11 = vector.load %arg2[%c0_11, %c0_12] : memref<32x256xbf16, #tpu.memory_space<vmem>>, vector<32x256xbf16>
    %cst = arith.constant dense<0.000000e+00> : vector<8x256xf32>
    %12 = tpu.matmul %10, %11, %cst {dimension_numbers = #tpu.dot_dimension_numbers<[1], [0], [0], [1], [0, 0, 1, 1], [], []>} : vector<8x32xbf16>, vector<32x256xbf16>, vector<8x256xf32> -> vector<8x256xf32>
    %13 = vector.broadcast %1 : vector<1x256xf32> to vector<8x256xf32>
    %14 = arith.addf %12, %13 : vector<8x256xf32>
    %cst_13 = arith.constant 0.000000e+00 : f32
    %15 = vector.broadcast %cst_13 : f32 to vector<8x256xf32>
    %16 = arith.maximumf %14, %15 : vector<8x256xf32>
    %cst_14 = arith.constant dense<0.000000e+00> : vector<8xf32>
    %17 = vector.multi_reduction <add>, %16, %cst_14 [1] : vector<8x256xf32> to vector<8xf32>
    %18 = vector.shape_cast %17 : vector<8xf32> to vector<8x1xf32>
    %19 = arith.mulf %16, %16 : vector<8x256xf32>
    %cst_15 = arith.constant dense<0.000000e+00> : vector<8xf32>
    %20 = vector.multi_reduction <add>, %19, %cst_15 [1] : vector<8x256xf32> to vector<8xf32>
    %21 = vector.shape_cast %20 : vector<8xf32> to vector<8x1xf32>
    %cst_16 = arith.constant 3.906250e-03 : f32
    %22 = vector.broadcast %cst_16 : f32 to vector<8x1xf32>
    %23 = arith.mulf %18, %22 : vector<8x1xf32>
    %cst_17 = arith.constant 3.906250e-03 : f32
    %24 = vector.broadcast %cst_17 : f32 to vector<8x1xf32>
    %25 = arith.mulf %21, %24 : vector<8x1xf32>
    %26 = arith.mulf %23, %23 : vector<8x1xf32>
    %27 = arith.subf %25, %26 : vector<8x1xf32>
    %cst_18 = arith.constant 0.000000e+00 : f32
    %28 = vector.broadcast %cst_18 : f32 to vector<8x1xf32>
    %29 = arith.maximumf %27, %28 : vector<8x1xf32>
    %30 = vector.broadcast %23 : vector<8x1xf32> to vector<8x256xf32>
    %31 = arith.subf %16, %30 : vector<8x256xf32>
    %cst_19 = arith.constant 9.99999974E-6 : f32
    %32 = vector.broadcast %cst_19 : f32 to vector<8x1xf32>
    %33 = arith.addf %29, %32 : vector<8x1xf32>
    %34 = math.rsqrt %33 : vector<8x1xf32>
    %35 = vector.broadcast %34 : vector<8x1xf32> to vector<8x256xf32>
    %36 = arith.mulf %31, %35 : vector<8x256xf32>
    %37 = vector.broadcast %2 : vector<1x256xf32> to vector<8x256xf32>
    %38 = arith.mulf %36, %37 : vector<8x256xf32>
    %39 = vector.broadcast %3 : vector<1x256xf32> to vector<8x256xf32>
    %40 = arith.addf %38, %39 : vector<8x256xf32>
    %41 = arith.truncf %40 : vector<8x256xf32> to vector<8x256xbf16>
    %c0_20 = arith.constant 0 : index
    %c0_21 = arith.constant 0 : index
    %c0_22 = arith.constant 0 : index
    %42 = vector.load %arg3[%c0_20, %c0_21, %c0_22] : memref<2x256x256xbf16, #tpu.memory_space<vmem>>, vector<1x256x256xbf16>
    %43 = vector.shape_cast %42 : vector<1x256x256xbf16> to vector<256x256xbf16>
    %cst_23 = arith.constant dense<0.000000e+00> : vector<8x256xf32>
    %44 = tpu.matmul %41, %43, %cst_23 {dimension_numbers = #tpu.dot_dimension_numbers<[1], [0], [0], [1], [0, 0, 1, 1], [], []>} : vector<8x256xbf16>, vector<256x256xbf16>, vector<8x256xf32> -> vector<8x256xf32>
    %45 = vector.broadcast %4 : vector<1x256xf32> to vector<8x256xf32>
    %46 = arith.addf %44, %45 : vector<8x256xf32>
    %cst_24 = arith.constant 0.000000e+00 : f32
    %47 = vector.broadcast %cst_24 : f32 to vector<8x256xf32>
    %48 = arith.maximumf %46, %47 : vector<8x256xf32>
    %cst_25 = arith.constant dense<0.000000e+00> : vector<8xf32>
    %49 = vector.multi_reduction <add>, %48, %cst_25 [1] : vector<8x256xf32> to vector<8xf32>
    %50 = vector.shape_cast %49 : vector<8xf32> to vector<8x1xf32>
    %51 = arith.mulf %48, %48 : vector<8x256xf32>
    %cst_26 = arith.constant dense<0.000000e+00> : vector<8xf32>
    %52 = vector.multi_reduction <add>, %51, %cst_26 [1] : vector<8x256xf32> to vector<8xf32>
    %53 = vector.shape_cast %52 : vector<8xf32> to vector<8x1xf32>
    %cst_27 = arith.constant 3.906250e-03 : f32
    %54 = vector.broadcast %cst_27 : f32 to vector<8x1xf32>
    %55 = arith.mulf %50, %54 : vector<8x1xf32>
    %cst_28 = arith.constant 3.906250e-03 : f32
    %56 = vector.broadcast %cst_28 : f32 to vector<8x1xf32>
    %57 = arith.mulf %53, %56 : vector<8x1xf32>
    %58 = arith.mulf %55, %55 : vector<8x1xf32>
    %59 = arith.subf %57, %58 : vector<8x1xf32>
    %cst_29 = arith.constant 0.000000e+00 : f32
    %60 = vector.broadcast %cst_29 : f32 to vector<8x1xf32>
    %61 = arith.maximumf %59, %60 : vector<8x1xf32>
    %62 = vector.broadcast %55 : vector<8x1xf32> to vector<8x256xf32>
    %63 = arith.subf %48, %62 : vector<8x256xf32>
    %cst_30 = arith.constant 9.99999974E-6 : f32
    %64 = vector.broadcast %cst_30 : f32 to vector<8x1xf32>
    %65 = arith.addf %61, %64 : vector<8x1xf32>
    %66 = math.rsqrt %65 : vector<8x1xf32>
    %67 = vector.broadcast %66 : vector<8x1xf32> to vector<8x256xf32>
    %68 = arith.mulf %63, %67 : vector<8x256xf32>
    %69 = vector.broadcast %5 : vector<1x256xf32> to vector<8x256xf32>
    %70 = arith.mulf %68, %69 : vector<8x256xf32>
    %71 = vector.broadcast %6 : vector<1x256xf32> to vector<8x256xf32>
    %72 = arith.addf %70, %71 : vector<8x256xf32>
    %73 = arith.truncf %72 : vector<8x256xf32> to vector<8x256xbf16>
    %c1_31 = arith.constant 1 : index
    %c0_32 = arith.constant 0 : index
    %c0_33 = arith.constant 0 : index
    %74 = vector.load %arg3[%c1_31, %c0_32, %c0_33] : memref<2x256x256xbf16, #tpu.memory_space<vmem>>, vector<1x256x256xbf16>
    %75 = vector.shape_cast %74 : vector<1x256x256xbf16> to vector<256x256xbf16>
    %cst_34 = arith.constant dense<0.000000e+00> : vector<8x256xf32>
    %76 = tpu.matmul %73, %75, %cst_34 {dimension_numbers = #tpu.dot_dimension_numbers<[1], [0], [0], [1], [0, 0, 1, 1], [], []>} : vector<8x256xbf16>, vector<256x256xbf16>, vector<8x256xf32> -> vector<8x256xf32>
    %77 = vector.broadcast %7 : vector<1x256xf32> to vector<8x256xf32>
    %78 = arith.addf %76, %77 : vector<8x256xf32>
    %cst_35 = arith.constant 0.000000e+00 : f32
    %79 = vector.broadcast %cst_35 : f32 to vector<8x256xf32>
    %80 = arith.maximumf %78, %79 : vector<8x256xf32>
    %cst_36 = arith.constant dense<0.000000e+00> : vector<8xf32>
    %81 = vector.multi_reduction <add>, %80, %cst_36 [1] : vector<8x256xf32> to vector<8xf32>
    %82 = vector.shape_cast %81 : vector<8xf32> to vector<8x1xf32>
    %83 = arith.mulf %80, %80 : vector<8x256xf32>
    %cst_37 = arith.constant dense<0.000000e+00> : vector<8xf32>
    %84 = vector.multi_reduction <add>, %83, %cst_37 [1] : vector<8x256xf32> to vector<8xf32>
    %85 = vector.shape_cast %84 : vector<8xf32> to vector<8x1xf32>
    %cst_38 = arith.constant 3.906250e-03 : f32
    %86 = vector.broadcast %cst_38 : f32 to vector<8x1xf32>
    %87 = arith.mulf %82, %86 : vector<8x1xf32>
    %cst_39 = arith.constant 3.906250e-03 : f32
    %88 = vector.broadcast %cst_39 : f32 to vector<8x1xf32>
    %89 = arith.mulf %85, %88 : vector<8x1xf32>
    %90 = arith.mulf %87, %87 : vector<8x1xf32>
    %91 = arith.subf %89, %90 : vector<8x1xf32>
    %cst_40 = arith.constant 0.000000e+00 : f32
    %92 = vector.broadcast %cst_40 : f32 to vector<8x1xf32>
    %93 = arith.maximumf %91, %92 : vector<8x1xf32>
    %94 = vector.broadcast %87 : vector<8x1xf32> to vector<8x256xf32>
    %95 = arith.subf %80, %94 : vector<8x256xf32>
    %cst_41 = arith.constant 9.99999974E-6 : f32
    %96 = vector.broadcast %cst_41 : f32 to vector<8x1xf32>
    %97 = arith.addf %93, %96 : vector<8x1xf32>
    %98 = math.rsqrt %97 : vector<8x1xf32>
    %99 = vector.broadcast %98 : vector<8x1xf32> to vector<8x256xf32>
    %100 = arith.mulf %95, %99 : vector<8x256xf32>
    %101 = vector.broadcast %8 : vector<1x256xf32> to vector<8x256xf32>
    %102 = arith.mulf %100, %101 : vector<8x256xf32>
    %103 = vector.broadcast %9 : vector<1x256xf32> to vector<8x256xf32>
    %104 = arith.addf %102, %103 : vector<8x256xf32>
    %105 = arith.truncf %104 : vector<8x256xf32> to vector<8x256xbf16>
    %c0_42 = arith.constant 0 : index
    %c0_43 = arith.constant 0 : index
    %106 = vector.load %arg5[%c0_42, %c0_43] : memref<256x128xbf16, #tpu.memory_space<vmem>>, vector<256x128xbf16>
    %cst_44 = arith.constant dense<0.000000e+00> : vector<8x128xf32>
    %107 = tpu.matmul %105, %106, %cst_44 {dimension_numbers = #tpu.dot_dimension_numbers<[1], [0], [0], [1], [0, 0, 1, 1], [], []>} : vector<8x256xbf16>, vector<256x128xbf16>, vector<8x128xf32> -> vector<8x128xf32>
    %c0_45 = arith.constant 0 : index
    %c0_46 = arith.constant 0 : index
    %108 = vector.load %arg6[%c0_45, %c0_46] : memref<1x128xf32, #tpu.memory_space<vmem>>, vector<1x128xf32>
    %109 = vector.broadcast %108 : vector<1x128xf32> to vector<8x128xf32>
    %110 = arith.addf %107, %109 : vector<8x128xf32>
    %111 = math.tanh %110 : vector<8x128xf32>
    %c0_47 = arith.constant 0 : index
    %c0_48 = arith.constant 0 : index
    %112 = vector.load %arg7[%c0_47, %c0_48] : memref<8x128xf32, #tpu.memory_space<vmem>>, vector<8x128xf32>
    tpu.vector_store %arg7[%c0_47, %c0_48], %111 {strides = array<i32>} : memref<8x128xf32, #tpu.memory_space<vmem>>, vector<8x128xf32>,
    return
  }
  func.func @transform_0(%arg0: i32) -> (i32, i32) {
    %c0_i32 = arith.constant 0 : i32
    %c0_i32_0 = arith.constant 0 : i32
    return %arg0, %c0_i32 : i32, i32
  }
  func.func @transform_1(%arg0: i32) -> (i32, i32) {
    %c0_i32 = arith.constant 0 : i32
    %c0_i32_0 = arith.constant 0 : i32
    %c0_i32_1 = arith.constant 0 : i32
    return %c0_i32, %c0_i32_0 : i32, i32
  }
  func.func @transform_2(%arg0: i32) -> (i32, i32, i32) {
    %c0_i32 = arith.constant 0 : i32
    %c0_i32_0 = arith.constant 0 : i32
    %c0_i32_1 = arith.constant 0 : i32
    %c0_i32_2 = arith.constant 0 : i32
    return %c0_i32, %c0_i32_0, %c0_i32_1 : i32, i32, i32
  }
  func.func @transform_3(%arg0: i32) -> (i32, i32) {
    %c0_i32 = arith.constant 0 : i32
    %c0_i32_0 = arith.constant 0 : i32
    %c0_i32_1 = arith.constant 0 : i32
    return %c0_i32, %c0_i32_0 : i32, i32
  }
  func.func @transform_4(%arg0: i32) -> (i32, i32) {
    %c0_i32 = arith.constant 0 : i32
    %c0_i32_0 = arith.constant 0 : i32
    %c0_i32_1 = arith.constant 0 : i32
    return %c0_i32, %c0_i32_0 : i32, i32
  }
  func.func @transform_5(%arg0: i32) -> (i32, i32) {
    %c0_i32 = arith.constant 0 : i32
    %c0_i32_0 = arith.constant 0 : i32
    %c0_i32_1 = arith.constant 0 : i32
    return %c0_i32, %c0_i32_0 : i32, i32
  }
  func.func @transform_6(%arg0: i32) -> (i32, i32) {
    %c0_i32 = arith.constant 0 : i32
    %c0_i32_0 = arith.constant 0 : i32
    return %arg0, %c0_i32 : i32, i32
  }
}

</mosaic_0001>

<bundles_post_ra>
// kernel: actor_forward.1
= control target key start
LH: loop header
LB: loop body
LE: loop exit
PB: predicated region body
PF: predicated region fallthrough
CT: control target
= control target key end

     0   :  { %11 = vsyncpa [#allocation3], 0  ;;  %s1469_s0 = inlined_call_operand.hbm [shape: f32[8,32], index: 0, kind: input, shape index: {}]   ;;  %s1470_s1 = inlined_call_operand.hbm [shape: bf16[32,256], index: 1, kind: input, shape index: {}]   ;;  %s1471_s2 = inlined_call_operand.hbm [shape: bf16[2,256,256], index: 2, kind: input, shape index: {}]   ;;  %s1472_s3 = inlined_call_operand.hbm [shape: f32[9,256], index: 3, kind: input, shape index: {}]   ;;  %s1473_s4 = inlined_call_operand.hbm [shape: bf16[256,128], index: 4, kind: input, shape index: {}]   ;;  %s1474_s5 = inlined_call_operand.vmem [shape: f32[1,128], index: 5, kind: input, shape index: {}]   ;;  %s1475_s6 = inlined_call_operand.vmem [shape: f32[8,128], index: 6, kind: output, shape index: {}]  }
   0x1   :  { %12 = vsyncpa [#allocation5], 0 }
   0x2   :  { %13 = vsyncpa [#allocation8], 0  ;;  %s1361_s21 = smov [#allocation4]  }
   0x3   :  { %s29_s22 = sshll.u32 %s1361_s21, 4  ;;  %s30_s22 = int_to_ptr.vmem [resolvable:$true] %s29_s22 }
   0x4   :  { %s1263_s23 = scalar_lea.vmem %s30_s22, 512  ;;  %p1268_p1 = scmp.lt.s32.totalorder %s30_s22, %s30_s22 }
   0x5   :  { %p1264_p0 = scmp.ne.s32.totalorder %s30_s22, %s1263_s23  ;;  %p1269_p2 = scmp.lt.s32.totalorder %s1263_s23, %s1263_s23 }
   0x7   :  { %p1270_p3 = por %p1269_p2, %p1268_p1 }
   0x9   :  { %p1271_p4 = pnand %p1270_p3, %p1264_p0 }
   0xb   :  { %1274 = shalt.err (!%p1271_p4)
}
   0xc   :  { %s1362_s24 = smov 128   ;;  %s1363_s25 = smov 8  }
   0xd   :  { %35 = dma.hbm_to_vmem [thread:$0]  %s1470_s1, 512, %s30_s22, [#allocation5], %s1362_s24, %s1362_s24, %s1363_s25  }
   0xe   :  { %s1364_s28 = smov [#allocation7]  }
   0xf   :  { %s53_s29 = sshll.u32 %s1364_s28, 4  ;;  %s54_s29 = int_to_ptr.vmem [resolvable:$true] %s53_s29 }
  0x10   :  { %s1283_s30 = scalar_lea.vmem %s54_s29, 512  ;;  %p1288_p6 = scmp.lt.s32.totalorder %s54_s29, %s54_s29 }
  0x11   :  { %p1284_p5 = scmp.ne.s32.totalorder %s54_s29, %s1283_s30  ;;  %p1289_p7 = scmp.lt.s32.totalorder %s1283_s30, %s1283_s30 }
  0x13   :  { %p1290_p8 = por %p1289_p7, %p1288_p6 }
  0x15   :  { %p1291_p9 = pnand %p1290_p8, %p1284_p5 }
  0x17   :  { %1294 = shalt.err (!%p1291_p9)
}
  0x18   :  { %s1365_s7 = smov 256   ;;  %s1366_s8 = smov 16  }
  0x19   :  { %59 = dma.hbm_to_vmem [thread:$0]  %s1472_s3, 512, %s54_s29, [#allocation8], %s1365_s7, %s1365_s7, %s1366_s8  }
  0x1a   :  { %s1367_s11 = smov [#allocation2]   ;;  %s1368_s13 = smov [#allocation6]  }
  0x1b   :  { %s20_s12 = sshll.u32 %s1367_s11, 4  ;;  %s41_s1 = sshll.u32 %s1368_s13, 4  ;;  %s21_s12 = int_to_ptr.vmem [resolvable:$true] %s20_s12  ;;  %s42_s1 = int_to_ptr.vmem [resolvable:$true] %s41_s1 }
  0x1c   :  { %s1303_s14 = scalar_lea.vmem %s21_s12, 128  ;;  %p1308_p11 = scmp.lt.s32.totalorder %s21_s12, %s21_s12 }
  0x1d   :  { %p1304_p10 = scmp.ne.s32.totalorder %s21_s12, %s1303_s14  ;;  %p1309_p12 = scmp.lt.s32.totalorder %s1303_s14, %s1303_s14 }
  0x1f   :  { %p1310_p13 = por %p1309_p12, %p1308_p11 }
  0x21   :  { %p1311_p0 = pnand %p1310_p13, %p1304_p10 }
  0x23   :  { %1314 = shalt.err (!%p1311_p0)
}
  0x24   :  { %23 = dma.hbm_to_vmem [thread:$0]  %s1469_s0, 128, %s21_s12, [#allocation3]  }
  0x25   :  { %s1323_s17 = scalar_lea.vmem %s42_s1, 8192  ;;  %p1328_p2 = scmp.lt.s32.totalorder %s42_s1, %s42_s1 }
  0x26   :  { %p1324_p1 = scmp.ne.s32.totalorder %s42_s1, %s1323_s17  ;;  %p1329_p3 = scmp.lt.s32.totalorder %s1323_s17, %s1323_s17 }
  0x28   :  { %p1330_p4 = por %p1329_p3, %p1328_p2 }
  0x2a   :  { %p1331_p5 = pnand %p1330_p4, %p1324_p1 }
  0x2c   :  { %1334 = shalt.err (!%p1331_p5)
}
  0x2d   :  { %47 = dma.hbm_to_vmem [thread:$0]  %s1471_s2, 8192, %s42_s1, [#allocation5], %s1362_s24, %s1362_s24, %s1363_s25  }
  0x2e   :  { %s1369_s19 = smov [#allocation9]  }
  0x2f   :  { %s65_s20 = sshll.u32 %s1369_s19, 4  ;;  %s66_s20 = int_to_ptr.vmem [resolvable:$true] %s65_s20 }
  0x30   :  { %s1343_s21 = scalar_lea.vmem %s66_s20, 2048  ;;  %p1348_p7 = scmp.lt.s32.totalorder %s66_s20, %s66_s20 }
  0x31   :  { %p1344_p6 = scmp.ne.s32.totalorder %s66_s20, %s1343_s21  ;;  %p1349_p8 = scmp.lt.s32.totalorder %s1343_s21, %s1343_s21 }
  0x33   :  { %p1350_p9 = por %p1349_p8, %p1348_p7 }
  0x35   :  { %p1351_p10 = pnand %p1350_p9, %p1344_p6 }
  0x37   :  { %1354 = shalt.err (!%p1351_p10)
}
  0x38   :  { %s1370_s0 = smov 64   ;;  %s1371_s22 = smov 4  }
  0x39   :  { %71 = dma.hbm_to_vmem [thread:$0]  %s1473_s4, 2048, %s66_s20, [#allocation8], %s1370_s0, %s1370_s0, %s1371_s22  }
  0x3a   :  { %1355 = dma.done.wait [#allocation3], 128  }
  0x3b   :  { %1356 = vsyncadd [#allocation3], 4294967168 }
  0x3c   :  { %1357 = dma.done.wait [#allocation5], 8704  }
  0x3d   :  { %1358 = vsyncadd [#allocation5], 4294958592 }
  0x3e   :  { %1359 = dma.done.wait [#allocation8], 2560  }
  0x3f   :  { %1360 = vsyncadd [#allocation8], 4294964736  ;;  %v1372_v0 = vmov 0   ;;  %v1129_v1 = vld [vmem:[#allocation4 + $0x14] ss:$8 sps:$4 sm:$0xff]   ;;  %vm144_vm0 = vcmask 261120   ;;  %v114_v22 = vlaneseq }
  0x40   :  { %180 = vmatprep.mubr.bf16.mxu0 %v1372_v0  ;;  %v1131_v2 = vld [vmem:[#allocation4 + $0x10] ss:$8 sps:$4 sm:$0xff]   ;;  %160 = vmatprep.subr.bf16.mxu0 %v1129_v1  ;;  %v1132_v3 = vld [vmem:[#allocation4 + $0x4] ss:$8 sps:$4 sm:$0xff]   ;;  %v1134_v4 = vld [vmem:[#allocation4] ss:$8 sps:$4 sm:$0xff]  }
  0x41   :  { %161 = vmatpush1.bf16.msra.mxu0 %v1131_v2  ;;  %v90_v5 = vld [vmem:[#allocation2] sm:$0xff]  ;;  %v1138_v9 = vld [vmem:[#allocation6 + $0x64] ss:$8 sps:$4 sm:$0xff]   ;;  %v1140_v10 = vld [vmem:[#allocation6 + $0x60] ss:$8 sps:$4 sm:$0xff]   ;;  %v115_v23 = vshrl.u32 %v114_v22, 7 }
  0x42   :  { %162 = vmatprep.subr.bf16.mxu0 %v1132_v3  ;;  %v108_v6 = vpack.c.bf16 %v90_v5, %v90_v5  ;;  %v1135_v7 = vld [vmem:[#allocation6 + $0x74] ss:$8 sps:$4 sm:$0xff]   ;;  %v1137_v8 = vld [vmem:[#allocation6 + $0x70] ss:$8 sps:$4 sm:$0xff]   ;;  %v1144_v13 = vld [vmem:[#allocation6 + $0x44] ss:$8 sps:$4 sm:$0xff]  }
  0x43   :  { %441 = vmatprep.subr.bf16.mxu1 %v1135_v7  ;;  %v1141_v11 = vld [vmem:[#allocation6 + $0x54] ss:$8 sps:$4 sm:$0xff]   ;;  %v1143_v12 = vld [vmem:[#allocation6 + $0x50] ss:$8 sps:$4 sm:$0xff]   ;;  %v1146_v14 = vld [vmem:[#allocation6 + $0x40] ss:$8 sps:$4 sm:$0xff]  }
  0x44   :  { %442 = vmatpush1.bf16.msra.mxu1 %v1137_v8  ;;  %v1147_v15 = vld [vmem:[#allocation6 + $0x34] ss:$8 sps:$4 sm:$0xff]   ;;  %v1149_v16 = vld [vmem:[#allocation6 + $0x30] ss:$8 sps:$4 sm:$0xff]   ;;  %v1150_v17 = vld [vmem:[#allocation6 + $0x24] ss:$8 sps:$4 sm:$0xff]  }
  0x45   :  { %163 = vmatpush1.bf16.msra.mxu0 %v1134_v4  ;;  %443 = vmatprep.subr.bf16.mxu1 %v1138_v9  ;;  %v1152_v18 = vld [vmem:[#allocation6 + $0x20] ss:$8 sps:$4 sm:$0xff]   ;;  %v1153_v19 = vld [vmem:[#allocation6 + $0x14] ss:$8 sps:$4 sm:$0xff]   ;;  %v1155_v20 = vld [vmem:[#allocation6 + $0x10] ss:$8 sps:$4 sm:$0xff]  }
  0x46   :  { %v1156_v21 = vld [vmem:[#allocation6 + $0x4] ss:$8 sps:$4 sm:$0xff]   ;;  %v1429_v24 = vsub.s32 0, %v115_v23  ;;  %v91_v25 = vld [vmem:[#allocation7] ss:$8 sm:$0x3] }
  0x47   :  { %v1431_v26 = vsub.s32 1, %v115_v23  ;;  %v1158_v41 = vld [vmem:[#allocation6] ss:$8 sps:$4 sm:$0xff]   ;;  %v1159_v42 = vld [vmem:[#allocation6 + $0xf4] ss:$8 sps:$4 sm:$0xff]  }
  0x48   :  { %1013 = vmatmul.mubr.msk.bf16.vlgmr.msra.gmra.mxu0 %vm144_vm0, %v108_v6  ;;  %444 = vmatpush1.bf16.msra.mxu1 %v1140_v10  ;;  %v117_v27 = vrot.slane %v91_v25, %v1429_v24  ;;  %v1161_v43 = vld [vmem:[#allocation6 + $0xf0] ss:$8 sps:$4 sm:$0xff]   ;;  %v1162_v44 = vld [vmem:[#allocation6 + $0xe4] ss:$8 sps:$4 sm:$0xff]   ;;  %v1164_v45 = vld [vmem:[#allocation6 + $0xe0] ss:$8 sps:$4 sm:$0xff]  }
  0x49   :  { %445 = vmatprep.subr.bf16.mxu1 %v1141_v11  ;;  %v121_v28 = vrot.slane %v91_v25, %v1431_v26  ;;  %v1165_v46 = vld [vmem:[#allocation6 + $0xd4] ss:$8 sps:$4 sm:$0xff]   ;;  %v1167_v47 = vld [vmem:[#allocation6 + $0xd0] ss:$8 sps:$4 sm:$0xff]   ;;  %v1168_v48 = vld [vmem:[#allocation6 + $0xc4] ss:$8 sps:$4 sm:$0xff]  }
  0x4a   :  { %v1170_v49 = vld [vmem:[#allocation6 + $0xc0] ss:$8 sps:$4 sm:$0xff]   ;;  %v1171_v50 = vld [vmem:[#allocation6 + $0xb4] ss:$8 sps:$4 sm:$0xff]   ;;  %v1173_v51 = vld [vmem:[#allocation6 + $0xb0] ss:$8 sps:$4 sm:$0xff]  }
  0x4b   :  { %v1174_v52 = vld [vmem:[#allocation6 + $0xa4] ss:$8 sps:$4 sm:$0xff]   ;;  %v1176_v53 = vld [vmem:[#allocation6 + $0xa0] ss:$8 sps:$4 sm:$0xff]   ;;  %v1177_v54 = vld [vmem:[#allocation6 + $0x94] ss:$8 sps:$4 sm:$0xff]  }
  0x4c   :  { %446 = vmatpush1.bf16.msra.mxu1 %v1143_v12  ;;  %v1179_v55 = vld [vmem:[#allocation6 + $0x90] ss:$8 sps:$4 sm:$0xff]   ;;  %v1180_v56 = vld [vmem:[#allocation6 + $0x84] ss:$8 sps:$4 sm:$0xff]   ;;  %v1182_v57 = vld [vmem:[#allocation6 + $0x80] ss:$8 sps:$4 sm:$0xff]  }
  0x4d   :  { %447 = vmatprep.subr.bf16.mxu1 %v1144_v13  ;;  %v93_v2 = vld [vmem:[#allocation7 + $0x1] ss:$8 sm:$0x3]  ;;  %v95_v3 = vld [vmem:[#allocation7 + $0x2] ss:$8 sm:$0x3] }
  0x4e   :  { %v214_v6 = vrot.slane %v93_v2, %v1429_v24  ;;  %v218_v7 = vrot.slane %v93_v2, %v1431_v26  ;;  %v227_v10 = vrot.slane %v95_v3, %v1429_v24  ;;  %v231_v11 = vrot.slane %v95_v3, %v1431_v26  ;;  %v1186_v22 = vld [vmem:[#allocation6 + $0x160] ss:$8 sps:$4 sm:$0xff]   ;;  %v1191_v23 = vld [vmem:[#allocation6 + $0x154] ss:$8 sps:$4 sm:$0xff]   ;;  %v1189_v25 = vld [vmem:[#allocation6 + $0x150] ss:$8 sps:$4 sm:$0xff]  }
  0x4f   :  { %v1230_v2 = vld [vmem:[#allocation6 + $0x184] ss:$8 sps:$4 sm:$0xff]   ;;  %v1228_v3 = vld [vmem:[#allocation6 + $0x180] ss:$8 sps:$4 sm:$0xff]  }
  0x50   :  { %448 = vmatpush1.bf16.msra.mxu1 %v1146_v14 }
  0x51   :  { %449 = vmatprep.subr.bf16.mxu1 %v1147_v15 }
  0x54   :  { %450 = vmatpush1.bf16.msra.mxu1 %v1149_v16 }
  0x55   :  { %451 = vmatprep.subr.bf16.mxu1 %v1150_v17 }
  0x58   :  { %452 = vmatpush1.bf16.msra.mxu1 %v1152_v18 }
  0x59   :  { %453 = vmatprep.subr.bf16.mxu1 %v1153_v19  ;;  %v1183_v19 = vld [vmem:[#allocation6 + $0x170] ss:$8 sps:$4 sm:$0xff]  }
  0x5c   :  { %454 = vmatpush1.bf16.msra.mxu1 %v1155_v20  ;;  %v1185_v20 = vld [vmem:[#allocation6 + $0x174] ss:$8 sps:$4 sm:$0xff]  }
  0x5d   :  { %455 = vmatprep.subr.bf16.mxu1 %v1156_v21  ;;  %v1188_v21 = vld [vmem:[#allocation6 + $0x164] ss:$8 sps:$4 sm:$0xff]   ;;  %735 = vmatprep.subr.bf16.mxu0 %v1185_v20 }
  0x5e   :  { %736 = vmatpush1.bf16.msra.mxu0 %v1183_v19 }
  0x5f   :  { %737 = vmatprep.subr.bf16.mxu0 %v1188_v21 }
  0x60   :  { %456 = vmatpush1.bf16.msra.mxu1 %v1158_v41 }
  0x61   :  { %457 = vmatprep.subr.bf16.mxu1 %v1159_v42 }
  0x62   :  { %738 = vmatpush1.bf16.msra.mxu0 %v1186_v22 }
  0x63   :  { %739 = vmatprep.subr.bf16.mxu0 %v1191_v23 }
  0x64   :  { %458 = vmatpush2.bf16.msra.mxu1 %v1161_v43 }
  0x65   :  { %459 = vmatprep.subr.bf16.mxu1 %v1162_v44 }
  0x66   :  { %740 = vmatpush1.bf16.msra.mxu0 %v1189_v25 }
  0x68   :  { %460 = vmatpush2.bf16.msra.mxu1 %v1164_v45 }
  0x69   :  { %461 = vmatprep.subr.bf16.mxu1 %v1165_v46 }
  0x6c   :  { %462 = vmatpush2.bf16.msra.mxu1 %v1167_v47 }
  0x6d   :  { %463 = vmatprep.subr.bf16.mxu1 %v1168_v48 }
  0x70   :  { %464 = vmatpush2.bf16.msra.mxu1 %v1170_v49 }
  0x71   :  { %465 = vmatprep.subr.bf16.mxu1 %v1171_v50 }
  0x74   :  { %466 = vmatpush2.bf16.msra.mxu1 %v1173_v51 }
  0x75   :  { %467 = vmatprep.subr.bf16.mxu1 %v1174_v52  ;;  %v1209_v52 = vld [vmem:[#allocation6 + $0x1f4] ss:$8 sps:$4 sm:$0xff]  }
  0x78   :  { %468 = vmatpush2.bf16.msra.mxu1 %v1176_v53  ;;  %v1207_v53 = vld [vmem:[#allocation6 + $0x1f0] ss:$8 sps:$4 sm:$0xff]  }
  0x79   :  { %469 = vmatprep.subr.bf16.mxu1 %v1177_v54  ;;  %v1212_v54 = vld [vmem:[#allocation6 + $0x1e4] ss:$8 sps:$4 sm:$0xff]  }
  0x7c   :  { %470 = vmatpush2.bf16.msra.mxu1 %v1179_v55  ;;  %v1210_v55 = vld [vmem:[#allocation6 + $0x1e0] ss:$8 sps:$4 sm:$0xff]  }
  0x7d   :  { %471 = vmatprep.subr.bf16.mxu1 %v1180_v56  ;;  %v1215_v56 = vld [vmem:[#allocation6 + $0x1d4] ss:$8 sps:$4 sm:$0xff]  }
  0x80   :  { %472 = vmatpush2.bf16.msra.mxu1 %v1182_v57  ;;  %v1213_v57 = vld [vmem:[#allocation6 + $0x1d0] ss:$8 sps:$4 sm:$0xff]  }
 0x108   :  { %v182_v29 = vpop.f32.mrf.mxu0 }
 0x109   :  { %v183_v30 = vadd.f32 %v182_v29, %v117_v27  ;;  %v1194_v27 = vld [vmem:[#allocation6 + $0x144] ss:$8 sps:$4 sm:$0xff]   ;;  %v1197_v29 = vld [vmem:[#allocation6 + $0x134] ss:$8 sps:$4 sm:$0xff]  }
 0x10a   :  { %v184_v31 = vpop.f32.mrf.mxu0  ;;  %741 = vmatprep.subr.bf16.mxu0 %v1194_v27 }
 0x10b   :  { %v185_v32 = vadd.f32 %v184_v31, %v121_v28  ;;  %v1435_v34 = vmax.f32 %v183_v30, 0.0  ;;  %v1192_v28 = vld [vmem:[#allocation6 + $0x140] ss:$8 sps:$4 sm:$0xff]   ;;  %v1195_v30 = vld [vmem:[#allocation6 + $0x130] ss:$8 sps:$4 sm:$0xff]  }
 0x10c   :  { %v186_v33 = vpop.f32.mrf.mxu0  ;;  %742 = vmatpush1.bf16.msra.mxu0 %v1192_v28  ;;  %v1200_v31 = vld [vmem:[#allocation6 + $0x124] ss:$8 sps:$4 sm:$0xff]  }
 0x10d   :  { %v190_v35 = vmax.f32 %v185_v32, 0.0  ;;  %v194_v39 = vmul.f32 %v1435_v34, %v1435_v34  ;;  %743 = vmatprep.subr.bf16.mxu0 %v1197_v29  ;;  %v1198_v32 = vld [vmem:[#allocation6 + $0x120] ss:$8 sps:$4 sm:$0xff]   ;;  %v1203_v33 = vld [vmem:[#allocation6 + $0x114] ss:$8 sps:$4 sm:$0xff]  }
 0x10e   :  { %v187_v36 = vpop.f32.mrf.mxu0 }
 0x10f   :  { %v191_v37 = vadd.f32 %v190_v35, %v1435_v34  ;;  %v195_v38 = vmul.f32 %v190_v35, %v190_v35  ;;  %v1204_v36 = vld [vmem:[#allocation6 + $0x100] ss:$8 sps:$4 sm:$0xff]  }
 0x110   :  { %744 = vmatpush1.bf16.msra.mxu0 %v1195_v30 }
 0x111   :  { %192 = vadd.xlane.f32.xlu0 %v191_v37  ;;  %v196_v40 = vadd.f32 %v195_v38, %v194_v39  ;;  %745 = vmatprep.subr.bf16.mxu0 %v1200_v31  ;;  %v97_v37 = vld [vmem:[#allocation7 + $0x3] ss:$8 sm:$0x3]  ;;  %v103_v31 = vld [vmem:[#allocation7 + $0x6] ss:$8 sm:$0x3] }
 0x112   :  { %v274_v38 = vrot.slane %v97_v37, %v1429_v24  ;;  %v278_v39 = vrot.slane %v97_v37, %v1431_v26 }
 0x114   :  { %746 = vmatpush1.bf16.msra.mxu0 %v1198_v32  ;;  %v568_v32 = vrot.slane %v103_v31, %v1429_v24 }
 0x115   :  { %197 = vadd.xlane.f32.xlu0 %v196_v40  ;;  %747 = vmatprep.subr.bf16.mxu0 %v1203_v33  ;;  %v572_v33 = vrot.slane %v103_v31, %v1431_v26 }
 0x19a   :  { %v193_v58 = vpop.xlane.xlu0 %192 }
 0x19b   :  { %v199_v59 = vmul.f32 0.00390625, %v193_v58  ;;  %v1216_v58 = vld [vmem:[#allocation6 + $0x1c0] ss:$8 sps:$4 sm:$0xff]  }
 0x19d   :  { %v201_v61 = vmul.f32 %v199_v59, %v199_v59  ;;  %v204_v4 = vsub.f32 %v1435_v34, %v199_v59  ;;  %v205_v5 = vsub.f32 %v190_v35, %v199_v59  ;;  %v1201_v34 = vld [vmem:[#allocation6 + $0x110] ss:$8 sps:$4 sm:$0xff]   ;;  %v1206_v35 = vld [vmem:[#allocation6 + $0x104] ss:$8 sps:$4 sm:$0xff]  }
 0x19e   :  { %v198_v60 = vpop.xlane.xlu0 %197  ;;  %748 = vmatpush1.bf16.msra.mxu0 %v1201_v34  ;;  %v1218_v59 = vld [vmem:[#allocation6 + $0x1c4] ss:$8 sps:$4 sm:$0xff]  }
 0x19f   :  { %v200_v62 = vmul.f32 0.00390625, %v198_v60  ;;  %749 = vmatprep.subr.bf16.mxu0 %v1206_v35  ;;  %v1221_v60 = vld [vmem:[#allocation6 + $0x1b4] ss:$8 sps:$4 sm:$0xff]  }
 0x1a1   :  { %v202_v63 = vsub.f32 %v200_v62, %v201_v61  ;;  %v1219_v61 = vld [vmem:[#allocation6 + $0x1b0] ss:$8 sps:$4 sm:$0xff]   ;;  %v1224_v62 = vld [vmem:[#allocation6 + $0x1a4] ss:$8 sps:$4 sm:$0xff]  }
 0x1a2   :  { %750 = vmatpush1.bf16.msra.mxu0 %v1204_v36 }
 0x1a3   :  { %v203_v0 = vmax.f32 %v202_v63, 0.0  ;;  %751 = vmatprep.subr.bf16.mxu0 %v1209_v52  ;;  %v1222_v63 = vld [vmem:[#allocation6 + $0x1a0] ss:$8 sps:$4 sm:$0xff]  }
 0x1a4   :  { %v1237_v52 = vld [vmem:[#allocation9 + $0x60] sm:$0xff]  }
 0x1a5   :  { %v206_v1 = vadd.f32 1e-05, %v203_v0  ;;  %v1227_v0 = vld [vmem:[#allocation6 + $0x194] ss:$8 sps:$4 sm:$0xff]  }
 0x1a6   :  { %752 = vmatpush2.bf16.msra.mxu0 %v1207_v53  ;;  %v1238_v53 = vld [vmem:[#allocation9 + $0x20] sm:$0xff]  }
 0x1a7   :  { %1247 = vrsqrt.f32 %v206_v1  ;;  %753 = vmatprep.subr.bf16.mxu0 %v1212_v54  ;;  %v1225_v1 = vld [vmem:[#allocation6 + $0x190] ss:$8 sps:$4 sm:$0xff]  }
 0x1a8   :  { %v1239_v54 = vld [vmem:[#allocation9 + $0x58] sm:$0xff]  }
 0x1aa   :  { %754 = vmatpush2.bf16.msra.mxu0 %v1210_v55  ;;  %v1240_v55 = vld [vmem:[#allocation9 + $0x18] sm:$0xff]  }
 0x1ab   :  { %755 = vmatprep.subr.bf16.mxu0 %v1215_v56  ;;  %v1241_v56 = vld [vmem:[#allocation9 + $0x50] sm:$0xff]  }
 0x1ae   :  { %756 = vmatpush2.bf16.msra.mxu0 %v1213_v57  ;;  %v1242_v57 = vld [vmem:[#allocation9 + $0x10] sm:$0xff]  }
 0x1af   :  { %757 = vmatprep.subr.bf16.mxu0 %v1218_v59  ;;  %v1244_v59 = vld [vmem:[#allocation9 + $0x8] sm:$0xff]  }
 0x1b2   :  { %758 = vmatpush2.bf16.msra.mxu0 %v1216_v58  ;;  %v1243_v58 = vld [vmem:[#allocation9 + $0x48] sm:$0xff]  }
 0x1b3   :  { %759 = vmatprep.subr.bf16.mxu0 %v1221_v60  ;;  %v1245_v60 = vld [vmem:[#allocation9 + $0x40] sm:$0xff]  }
 0x1b4   :  { %v1248_v8 = vpop.eup %1247 }
 0x1b5   :  { %v209_v9 = vmul.f32 %v1248_v8, %v205_v5  ;;  %v208_v12 = vmul.f32 %v1248_v8, %v204_v4 }
 0x1b6   :  { %760 = vmatpush2.bf16.msra.mxu0 %v1219_v61  ;;  %v1246_v61 = vld [vmem:[#allocation9] sm:$0xff]  }
 0x1b7   :  { %v222_v13 = vmul.f32 %v218_v7, %v209_v9  ;;  %v221_v14 = vmul.f32 %v214_v6, %v208_v12  ;;  %761 = vmatprep.subr.bf16.mxu0 %v1224_v62  ;;  %v99_v12 = vld [vmem:[#allocation7 + $0x4] ss:$8 sm:$0x3] }
 0x1b9   :  { %v235_v15 = vadd.f32 %v231_v11, %v222_v13  ;;  %v234_v16 = vadd.f32 %v227_v10, %v221_v14  ;;  %v101_v13 = vld [vmem:[#allocation7 + $0x5] ss:$8 sm:$0x3] }
 0x1ba   :  { %762 = vmatpush2.bf16.msra.mxu0 %v1222_v63  ;;  %v520_v20 = vrot.slane %v101_v13, %v1429_v24  ;;  %v524_v21 = vrot.slane %v101_v13, %v1431_v26 }
 0x1bb   :  { %v237_v17 = vpack.c.bf16 %v235_v15, %v235_v15  ;;  %v236_v18 = vpack.c.bf16 %v234_v16, %v234_v16  ;;  %763 = vmatprep.subr.bf16.mxu0 %v1227_v0  ;;  %v507_v16 = vrot.slane %v99_v12, %v1429_v24 }
 0x1bd   :  { %473 = vmatprep.mubr.bf16.mxu1 %v237_v17  ;;  %v511_v17 = vrot.slane %v99_v12, %v1431_v26 }
 0x1be   :  { %474 = vmatmul.mubr.bf16.vlgmr.msra.gmra.mxu1 %v236_v18  ;;  %764 = vmatpush2.bf16.msra.mxu0 %v1225_v1 }
 0x1bf   :  { %765 = vmatprep.subr.bf16.mxu0 %v1230_v2 }
 0x1c2   :  { %766 = vmatpush2.bf16.msra.mxu0 %v1228_v3 }
 0x27e   :  { %v475_v40 = vpop.f32.mrf.mxu1 }
 0x27f   :  { %v476_v41 = vadd.f32 %v475_v40, %v274_v38 }
 0x280   :  { %v477_v42 = vpop.f32.mrf.mxu1 }
 0x281   :  { %v478_v43 = vadd.f32 %v477_v42, %v278_v39  ;;  %v482_v45 = vmax.f32 %v476_v41, 0.0 }
 0x282   :  { %v479_v44 = vpop.f32.mrf.mxu1 }
 0x283   :  { %v483_v46 = vmax.f32 %v478_v43, 0.0  ;;  %v487_v50 = vmul.f32 %v482_v45, %v482_v45 }
 0x284   :  { %v480_v47 = vpop.f32.mrf.mxu1 }
 0x285   :  { %v484_v48 = vadd.f32 %v483_v46, %v482_v45  ;;  %v488_v49 = vmul.f32 %v483_v46, %v483_v46  ;;  %v1232_v47 = vld [vmem:[#allocation9 + $0x38] sm:$0xff]  }
 0x287   :  { %485 = vadd.xlane.f32.xlu1 %v484_v48  ;;  %v489_v51 = vadd.f32 %v488_v49, %v487_v50  ;;  %v1233_v48 = vld [vmem:[#allocation9 + $0x70] sm:$0xff]   ;;  %v1235_v50 = vld [vmem:[#allocation9 + $0x68] sm:$0xff]  }
 0x288   :  { %v1234_v49 = vld [vmem:[#allocation9 + $0x30] sm:$0xff]  }
 0x28b   :  { %490 = vadd.xlane.f32.xlu1 %v489_v51  ;;  %v1236_v51 = vld [vmem:[#allocation9 + $0x28] sm:$0xff]  }
 0x310   :  { %v486_v4 = vpop.xlane.xlu1 %485 }
 0x311   :  { %v492_v5 = vmul.f32 0.00390625, %v486_v4 }
 0x313   :  { %v494_v7 = vmul.f32 %v492_v5, %v492_v5  ;;  %v497_v14 = vsub.f32 %v482_v45, %v492_v5  ;;  %v498_v15 = vsub.f32 %v483_v46, %v492_v5  ;;  %v1231_v46 = vld [vmem:[#allocation9 + $0x78] sm:$0xff]  }
 0x314   :  { %v491_v6 = vpop.xlane.xlu1 %490  ;;  %1095 = vmatprep.subr.bf16.mxu1 %v1231_v46 }
 0x315   :  { %v493_v8 = vmul.f32 0.00390625, %v491_v6  ;;  %1096 = vmatpush3.bf16.msra.mxu1 %v1232_v47  ;;  %v105_v6 = vld [vmem:[#allocation7 + $0x7] ss:$8 sm:$0x3] }
 0x316   :  { %1097 = vmatprep.subr.bf16.mxu1 %v1233_v48 }
 0x317   :  { %v495_v9 = vsub.f32 %v493_v8, %v494_v7  ;;  %v107_v7 = vld [vmem:[#allocation7 + $0x10] ss:$8 sm:$0x3] }
 0x319   :  { %v496_v10 = vmax.f32 %v495_v9, 0.0  ;;  %1098 = vmatpush3.bf16.msra.mxu1 %v1234_v49 }
 0x31a   :  { %1099 = vmatprep.subr.bf16.mxu1 %v1235_v50 }
 0x31b   :  { %v499_v11 = vadd.f32 1e-05, %v496_v10  ;;  %v801_v10 = vrot.slane %v105_v6, %v1429_v24 }
 0x31d   :  { %1249 = vrsqrt.f32 %v499_v11  ;;  %1100 = vmatpush3.bf16.msra.mxu1 %v1236_v51  ;;  %v805_v11 = vrot.slane %v105_v6, %v1431_v26 }
 0x31e   :  { %1101 = vmatprep.subr.bf16.mxu1 %v1237_v52 }
 0x321   :  { %1102 = vmatpush3.bf16.msra.mxu1 %v1238_v53 }
 0x322   :  { %1103 = vmatprep.subr.bf16.mxu1 %v1239_v54 }
 0x325   :  { %1104 = vmatpush3.bf16.msra.mxu1 %v1240_v55 }
 0x326   :  { %1105 = vmatprep.subr.bf16.mxu1 %v1241_v56 }
 0x329   :  { %1106 = vmatpush3.bf16.msra.mxu1 %v1242_v57 }
 0x32a   :  { %v1250_v18 = vpop.eup %1249  ;;  %1107 = vmatprep.subr.bf16.mxu1 %v1243_v58 }
 0x32b   :  { %v502_v19 = vmul.f32 %v1250_v18, %v498_v15  ;;  %v501_v22 = vmul.f32 %v1250_v18, %v497_v14  ;;  %v814_v14 = vrot.slane %v107_v7, %v1429_v24  ;;  %v818_v15 = vrot.slane %v107_v7, %v1431_v26 }
 0x32d   :  { %v515_v23 = vmul.f32 %v511_v17, %v502_v19  ;;  %v514_v25 = vmul.f32 %v507_v16, %v501_v22  ;;  %1108 = vmatpush3.bf16.msra.mxu1 %v1244_v59 }
 0x32e   :  { %1109 = vmatprep.subr.bf16.mxu1 %v1245_v60 }
 0x32f   :  { %v528_v27 = vadd.f32 %v524_v21, %v515_v23  ;;  %v527_v28 = vadd.f32 %v520_v20, %v514_v25  ;;  %v1078_v25 = vld [vmem:[%s1474_s5] ss:$0 sm:$0xff] }
 0x331   :  { %v530_v29 = vpack.c.bf16 %v528_v27, %v528_v27  ;;  %v529_v30 = vpack.c.bf16 %v527_v28, %v527_v28  ;;  %1110 = vmatpush3.bf16.msra.mxu1 %v1246_v61 }
 0x333   :  { %767 = vmatprep.mubr.bf16.mxu0 %v530_v29 }
 0x334   :  { %768 = vmatmul.mubr.bf16.vlgmr.msra.gmra.mxu0 %v529_v30 }
 0x3f4   :  { %v769_v34 = vpop.f32.mrf.mxu0 }
 0x3f5   :  { %v770_v35 = vadd.f32 %v769_v34, %v568_v32 }
 0x3f6   :  { %v771_v36 = vpop.f32.mrf.mxu0 }
 0x3f7   :  { %v1453_v37 = vmax.f32 %v770_v35, 0.0  ;;  %v772_v38 = vadd.f32 %v771_v36, %v572_v33 }
 0x3f8   :  { %v773_v39 = vpop.f32.mrf.mxu0 }
 0x3f9   :  { %v777_v40 = vmax.f32 %v772_v38, 0.0  ;;  %v781_v43 = vmul.f32 %v1453_v37, %v1453_v37 }
 0x3fa   :  { %v774_v41 = vpop.f32.mrf.mxu0 }
 0x3fb   :  { %v778_v42 = vadd.f32 %v777_v40, %v1453_v37  ;;  %v782_v44 = vmul.f32 %v777_v40, %v777_v40 }
 0x3fd   :  { %779 = vadd.xlane.f32.xlu0 %v778_v42  ;;  %v783_v45 = vadd.f32 %v782_v44, %v781_v43 }
 0x3ff   :  { %784 = vadd.xlane.f32.xlu1 %v783_v45 }
 0x486   :  { %v780_v62 = vpop.xlane.xlu0 %779 }
 0x487   :  { %v786_v63 = vmul.f32 0.00390625, %v780_v62 }
 0x488   :  { %v785_v0 = vpop.xlane.xlu1 %784 }
 0x489   :  { %v787_v1 = vmul.f32 0.00390625, %v785_v0  ;;  %v788_v2 = vmul.f32 %v786_v63, %v786_v63  ;;  %v791_v8 = vsub.f32 %v1453_v37, %v786_v63  ;;  %v792_v9 = vsub.f32 %v777_v40, %v786_v63 }
 0x48b   :  { %v789_v3 = vsub.f32 %v787_v1, %v788_v2 }
 0x48d   :  { %v790_v4 = vmax.f32 %v789_v3, 0.0 }
 0x48f   :  { %v793_v5 = vadd.f32 1e-05, %v790_v4 }
 0x491   :  { %1251 = vrsqrt.f32 %v793_v5 }
 0x49e   :  { %v1252_v12 = vpop.eup %1251 }
 0x49f   :  { %v796_v13 = vmul.f32 %v1252_v12, %v792_v9  ;;  %v795_v16 = vmul.f32 %v1252_v12, %v791_v8 }
 0x4a1   :  { %v809_v17 = vmul.f32 %v805_v11, %v796_v13  ;;  %v808_v18 = vmul.f32 %v801_v10, %v795_v16 }
 0x4a3   :  { %v822_v19 = vadd.f32 %v818_v15, %v809_v17  ;;  %v821_v20 = vadd.f32 %v814_v14, %v808_v18 }
 0x4a5   :  { %v824_v21 = vpack.c.bf16 %v822_v19, %v822_v19  ;;  %v823_v22 = vpack.c.bf16 %v821_v20, %v821_v20 }
 0x4a7   :  { %992 = vmatprep.mubr.bf16.mxu1 %v824_v21 }
 0x4a8   :  { %993 = vmatmul.mubr.bf16.vlgmr.msra.gmra.mxu1 %v823_v22 }
 0x568   :  { %v1111_v23 = vpop.f32.mrf.mxu1 }
 0x56a   :  { %v1112_v27 = vpop.f32.mrf.mxu1 }
 0x56b   :  { %v1113_v28 = vadd.f32 %v1112_v27, %v1111_v23 }
 0x56c   :  { %v1114_v29 = vpop.f32.mrf.mxu1 }
 0x56d   :  { %v995_v24 = vadd.f32 %v1113_v28, %v1078_v25 }
 0x56e   :  { %v1115_v30 = vpop.f32.mrf.mxu1 }
 0x56f   :  { %1253 = vtanh.f32 %v995_v24 }
 0x57c   :  { %v1254_v26 = vpop.eup %1253 }
 0x57d   :  { %1001 = vst [vmem:[%s1475_s6] sm:$0xff] %v1254_v26 }
 0x57e   :  { %1006 = vsyncpa [#allocation3], 1 }
 0x57f   :  { %1007 = vsyncpa [#allocation5], 1 }
 0x580   :  { %1008 = vsyncpa [#allocation8], 1 }

</bundles_post_ra>
